<compile_context>
chip_gen: v7x
topology: tpu7x:2x2x1
jax: 0.10.0
libtpu: 0.0.40
codegen_flags: <defaults>
</compile_context>

<pallas_src>
import math

import jax
import jax.numpy as jnp
from jax.experimental import pallas as pl
from jax.experimental.pallas import tpu as pltpu


def _ssgp_kernel(x_ref, w1_ref, phi_ref, w2_ref, o_ref):
    # sim = X_blk @ blockdiag(s2pi^T) : [rows_tile, P*B]   (dense K=128 MXU matmul)
    sim = jnp.dot(x_ref[...], w1_ref[...], preferred_element_type=jnp.float32)
    # single transcendental per (sample, basis):
    #   A*cos(sim + phi) == -sin(sim)*w_s + cos(sim)*w_c   (A folded into W2)
    g = jnp.cos(sim + phi_ref[...])
    # out = g @ blockdiag(A*Psi) : [rows_tile, 128]  (bit-exact packed [., d] output)
    o_ref[...] = jnp.dot(g, w2_ref[...], preferred_element_type=jnp.float32)


def _pick_rows_tile(rows):
    """Packed-row tile: big enough to amortize the ~0.35us/step pipeline cost,
    small enough to keep >=2 grid steps (v7x has 2 TensorCores) and fit VMEM."""
    target = 1024                         # 1024 rows == 32768 samples at d=4
    if rows <= 8:
        return rows                       # single block == full array dim (allowed)
    if rows <= 2 * target:
        half = pl.cdiv(rows, 2)           # split ~in half across the two TCs
        return ((half + 7) // 8) * 8      # 8-sublane aligned; ragged tail is fine
    return target


def ssgp_forward(x, params):
    """x: [N, 1, d] float32.  Returns [N, 1, d] float32 (== SSGP.forward; t unused)."""
    N = x.shape[0]
    B, d = params["epsilon"].shape
    assert 128 % d == 0, "packed layout needs d | 128"
    # TODO(synk): for d not dividing 128, fall back to a [d, N]-transposed layout.
    P = 128 // d                                   # samples per packed 128-lane row

    lam = params["lam"]
    eta = params["eta"]
    S = params["S"]
    epsilon = params["epsilon"]
    w = params["w"]                                # [2B]

    # ---- tiny parameter-only glue (plain JAX, O(B*d); amortized over all N) ----
    s = epsilon * (1.0 / (2.0 * math.pi * jnp.abs(lam)))[None, :]       # [B, d]
    R = jnp.eye(d, dtype=jnp.float32).at[: d // 2, : d // 2].set(0.0)
    M = S - (eta ** 2) * R                                              # [d, d]
    Psi = 2.0 * math.pi * (s @ M.T)                                     # [B, d]
    s2pi = (2.0 * math.pi * s).astype(jnp.float32)                      # [B, d]

    w_s = w[:B].astype(jnp.float32)
    w_c = w[B:].astype(jnp.float32)
    amp = jnp.sqrt(w_s * w_s + w_c * w_c)                               # [B]
    phi = jnp.arctan2(w_s, w_c)                                         # [B]
    psiA = (amp[:, None] * Psi).astype(jnp.float32)                     # [B, d]

    # Block-diagonal lift of the per-sample weights onto packed 128-lane rows.
    eyeP = jnp.eye(P, dtype=jnp.float32)
    # W1[j*d + a, k*B + b] = delta_jk * s2pi[b, a]   -> [P*d, P*B] = [128, P*B]
    W1 = (eyeP[:, None, :, None] * s2pi.T[None, :, None, :]
          ).reshape(P * d, P * B).astype(jnp.float32)
    # W2[j*B + b, k*d + a] = delta_jk * psiA[b, a]   -> [P*B, P*d] = [P*B, 128]
    W2 = (eyeP[:, None, :, None] * psiA[None, :, None, :]
          ).reshape(P * B, P * d).astype(jnp.float32)
    phi_t = jnp.tile(phi, P).reshape(1, P * B).astype(jnp.float32)      # [1, P*B]

    # ---- pack x: [N, d] -> [rows, 128]  (bit-exact reshape, no transpose) ----
    x2d = x.reshape(N, d).astype(jnp.float32)
    rem = N % P
    if rem:                                        # pad at most P-1 tail samples
        x2d = jnp.pad(x2d, ((0, P - rem), (0, 0)))
    rows = x2d.shape[0] // P
    x_packed = x2d.reshape(rows, P * d)            # [rows, 128]

    rows_tile = _pick_rows_tile(rows)
    grid = (pl.cdiv(rows, rows_tile),)             # ragged last block handled by Pallas
                                                   # (row-independent math; OOB rows dropped)

    out_packed = pl.pallas_call(
        _ssgp_kernel,
        out_shape=jax.ShapeDtypeStruct((rows, P * d), jnp.float32),
        grid=grid,
        in_specs=[
            pl.BlockSpec((rows_tile, P * d), lambda i: (i, 0)),   # x: streamed over rows
            pl.BlockSpec((P * d, P * B), lambda i: (0, 0)),       # W1: VMEM-resident
            pl.BlockSpec((1, P * B), lambda i: (0, 0)),           # phi: VMEM-resident
            pl.BlockSpec((P * B, P * d), lambda i: (0, 0)),       # W2: VMEM-resident
        ],
        out_specs=pl.BlockSpec((rows_tile, P * d), lambda i: (i, 0)),
        compiler_params=pltpu.CompilerParams(
            dimension_semantics=("parallel",)),    # shard row tiles across TCs (v7x)
    )(x_packed, W1, phi_t, W2)

    out2d = out_packed.reshape(rows * P, d)        # bit-exact unpack, no transpose
    if rows * P != N:
        out2d = out2d[:N]
    return out2d.reshape(N, 1, d)


def init_ssgp_params(key, input_dim, basis, friction=True):
    """Deterministic parameter construction mirroring SSGP.__init__ (+ mean_w)."""
    k_b, k_eps = jax.random.split(key, 2)
    d = input_dim

    a = jnp.ones((d,), jnp.float32) * 0.1
    b = 0.0001 * (jax.random.uniform(k_b, (basis * 2,), jnp.float32) - 0.5)
    sqrtC = jnp.ones((basis, basis), jnp.float32) * 0.01 + jnp.eye(basis) * 0.01
    lam = jnp.ones((d,), jnp.float32) * 1.5
    eta = jnp.float32(1e-16) if friction else jnp.float32(0.0)

    # permutation_tensor(d): cat([I[d//2:], -I[:d//2]])
    I = jnp.eye(d, dtype=jnp.float32)
    S = jnp.concatenate([I[d // 2:], -I[:d // 2]], axis=0)

    tmp = jax.random.normal(k_eps, (basis // 2, d), jnp.float32)
    epsilon = jnp.concatenate([tmp, -tmp], axis=0)                  # [basis, d]

    # mean_w(): w = b  (deterministic stand-in for sampling_epsilon_f)
    w = b * 1.0

    return dict(a=a, b=b, sqrtC=sqrtC, lam=lam, eta=eta, S=S,
                epsilon=epsilon, w=w)


def ssgp_forward_ref(x, params):
    """Pure-JAX reference following the PyTorch forward line by line."""
    d = params["epsilon"].shape[1]
    B = params["epsilon"].shape[0]
    N = x.shape[0]
    lam, eta, S, epsilon, w = (params["lam"], params["eta"], params["S"],
                               params["epsilon"], params["w"])

    s = epsilon @ jnp.diag(1.0 / jnp.sqrt(4.0 * math.pi ** 2 * lam ** 2))
    R = jnp.eye(d).at[:d // 2, :d // 2].set(0.0)
    Psi = 2.0 * math.pi * ((S - eta ** 2 * R) @ s.T).T               # [B, d]
    xs = x.reshape(N, d)
    sim = 2.0 * math.pi * s @ xs.T                                   # [B, N]
    basis_s = -jnp.sin(sim)
    basis_c = jnp.cos(sim)
    # f[n, i] = sum_k Psi[k,i] * (basis_s[k,n]*w[k] + basis_c[k,n]*w[B+k])
    G = basis_s * w[:B, None] + basis_c * w[B:, None]                # [B, N]
    f = G.T @ Psi                                                    # [N, d]
    return f.reshape(N, 1, d)


if __name__ == "__main__":
    input_dim = 4      # d
    basis = 16         # num_basis (epsilon is [basis, d])

    key = jax.random.PRNGKey(0)
    k_params, k_x1, k_x2 = jax.random.split(key, 3)
    params = init_ssgp_params(k_params, input_dim, basis, friction=True)

    # Two small cases: 8 samples (single packed row) and 300 samples
    # (exercises padding, multi-tile grid, and a ragged last block).
    for n_samples, kx in ((8, k_x1), (300, k_x2)):
        x = jax.random.normal(kx, (n_samples, 1, input_dim), jnp.float32)
        t = jnp.zeros((n_samples,), jnp.float32)   # `t` is unused by forward

        out = jax.block_until_ready(ssgp_forward(x, params))
        ref = ssgp_forward_ref(x, params)

        assert out.shape == (n_samples, 1, input_dim)
        # Default (single-pass) MXU precision; outputs are O(1e-4), so a 2e-5
        # absolute tolerance is a ~5-10% relative check — tight enough to catch
        # real math/layout bugs while tolerating bf16-pass rounding.
        err = float(jnp.max(jnp.abs(out - ref)))
        assert jnp.allclose(out, ref, atol=2e-5, rtol=1e-5), err

    print("KERNEL_OK")
</pallas_src>

<mosaic_0001>
module attributes {stable_mosaic.version = 11 : i64} {
  func.func @_ssgp_kernel(%arg0: i32, %arg1: memref<1x128xf32, #tpu.memory_space<vmem>>, %arg2: memref<128x512xf32, #tpu.memory_space<vmem>>, %arg3: memref<1x512xf32, #tpu.memory_space<vmem>>, %arg4: memref<512x128xf32, #tpu.memory_space<vmem>>, %arg5: memref<1x128xf32, #tpu.memory_space<vmem>>) attributes {dimension_semantics = [#tpu.dimension_semantics<parallel>], iteration_bounds = array<i64: 1>, scalar_prefetch = 0 : i64, scratch_operands = 0 : i64, tpu.core_type = #tpu.core_type<tc>, window_params = [{transform_indices = @transform_0, window_bounds = array<i64: 1, 128>}, {pipeline_mode = #tpu.pipeline_mode<synchronous>, transform_indices = @transform_1, window_bounds = array<i64: 128, 512>}, {pipeline_mode = #tpu.pipeline_mode<synchronous>, transform_indices = @transform_2, window_bounds = array<i64: 1, 512>}, {pipeline_mode = #tpu.pipeline_mode<synchronous>, transform_indices = @transform_3, window_bounds = array<i64: 512, 128>}, {transform_indices = @transform_4, window_bounds = array<i64: 1, 128>}]} {
    %c0 = arith.constant 0 : index
    %c0_0 = arith.constant 0 : index
    %0 = vector.load %arg1[%c0, %c0_0] : memref<1x128xf32, #tpu.memory_space<vmem>>, vector<1x128xf32>
    %c0_1 = arith.constant 0 : index
    %c0_2 = arith.constant 0 : index
    %1 = vector.load %arg2[%c0_1, %c0_2] : memref<128x512xf32, #tpu.memory_space<vmem>>, vector<128x512xf32>
    %cst = arith.constant dense<0.000000e+00> : vector<1x512xf32>
    %2 = tpu.matmul %0, %1, %cst {dimension_numbers = #tpu.dot_dimension_numbers<[1], [0], [0], [1], [0, 0, 1, 1], [], []>} : vector<1x128xf32>, vector<128x512xf32>, vector<1x512xf32> -> vector<1x512xf32>
    %c0_3 = arith.constant 0 : index
    %c0_4 = arith.constant 0 : index
    %3 = vector.load %arg3[%c0_3, %c0_4] : memref<1x512xf32, #tpu.memory_space<vmem>>, vector<1x512xf32>
    %4 = arith.addf %2, %3 : vector<1x512xf32>
    %5 = math.cos %4 : vector<1x512xf32>
    %c0_5 = arith.constant 0 : index
    %c0_6 = arith.constant 0 : index
    %6 = vector.load %arg4[%c0_5, %c0_6] : memref<512x128xf32, #tpu.memory_space<vmem>>, vector<512x128xf32>
    %cst_7 = arith.constant dense<0.000000e+00> : vector<1x128xf32>
    %7 = tpu.matmul %5, %6, %cst_7 {dimension_numbers = #tpu.dot_dimension_numbers<[1], [0], [0], [1], [0, 0, 1, 1], [], []>} : vector<1x512xf32>, vector<512x128xf32>, vector<1x128xf32> -> vector<1x128xf32>
    %c0_8 = arith.constant 0 : index
    %c0_9 = arith.constant 0 : index
    %8 = vector.load %arg5[%c0_8, %c0_9] : memref<1x128xf32, #tpu.memory_space<vmem>>, vector<1x128xf32>
    tpu.vector_store %arg5[%c0_8, %c0_9], %7 {strides = array<i32>} : memref<1x128xf32, #tpu.memory_space<vmem>>, vector<1x128xf32>,
    return
  }
  func.func @transform_0(%arg0: i32) -> (i32, i32) {
    %c0_i32 = arith.constant 0 : i32
    %c0_i32_0 = arith.constant 0 : i32
    return %arg0, %c0_i32 : i32, i32
  }
  func.func @transform_1(%arg0: i32) -> (i32, i32) {
    %c0_i32 = arith.constant 0 : i32
    %c0_i32_0 = arith.constant 0 : i32
    %c0_i32_1 = arith.constant 0 : i32
    return %c0_i32, %c0_i32_0 : i32, i32
  }
  func.func @transform_2(%arg0: i32) -> (i32, i32) {
    %c0_i32 = arith.constant 0 : i32
    %c0_i32_0 = arith.constant 0 : i32
    %c0_i32_1 = arith.constant 0 : i32
    return %c0_i32, %c0_i32_0 : i32, i32
  }
  func.func @transform_3(%arg0: i32) -> (i32, i32) {
    %c0_i32 = arith.constant 0 : i32
    %c0_i32_0 = arith.constant 0 : i32
    %c0_i32_1 = arith.constant 0 : i32
    return %c0_i32, %c0_i32_0 : i32, i32
  }
  func.func @transform_4(%arg0: i32) -> (i32, i32) {
    %c0_i32 = arith.constant 0 : i32
    %c0_i32_0 = arith.constant 0 : i32
    return %arg0, %c0_i32 : i32, i32
  }
}

</mosaic_0001>

<bundles_post_ra>
// kernel: tpu_custom_call.1
= control target key start
LH: loop header
LB: loop body
LE: loop exit
PB: predicated region body
PF: predicated region fallthrough
CT: control target
= control target key end

     0   :  { %9 = vsyncpa [#allocation3], 0  ;;  %s1688_s0 = inlined_call_operand.hbm [shape: f32[1,128], index: 0, kind: input, shape index: {}]   ;;  %s1689_s1 = inlined_call_operand.hbm [shape: f32[128,512], index: 1, kind: input, shape index: {}]   ;;  %s1690_s2 = inlined_call_operand.vmem [shape: f32[1,512], index: 2, kind: input, shape index: {}]   ;;  %s1691_s3 = inlined_call_operand.hbm [shape: f32[512,128], index: 3, kind: input, shape index: {}]   ;;  %s1692_s4 = inlined_call_operand.hbm [shape: f32[1,128], index: 4, kind: output, shape index: {}]  }
   0x1   :  { %10 = vsyncpa [#allocation6], 0 }
   0x2   :  { %11 = vsyncpa [#allocation4], 0  ;;  %s1274_s15 = smov [#allocation5]   ;;  %s1180_s19 = scalar_lea.hbm %s1689_s1, 8192 }
   0x3   :  { %s27_s16 = sshll.u32 %s1274_s15, 4  ;;  %p1181_p0 = scmp.ne.s32.totalorder %s1689_s1, %s1180_s19  ;;  %s28_s16 = int_to_ptr.vmem [resolvable:$true] %s27_s16 }
   0x4   :  { %p1184_p1 = scmp.lt.u32.totalorder %s1180_s19, %s1689_s1 }
   0x6   :  { %p1186_p2 = pnand %p1184_p1, %p1181_p0 }
   0x8   :  { %1189 = shalt.err (!%p1186_p2)
}
   0x9   :  { %s1190_s24 = scalar_lea.vmem %s28_s16, 8192  ;;  %p1195_p4 = scmp.lt.s32.totalorder %s28_s16, %s28_s16 }
   0xa   :  { %p1191_p3 = scmp.ne.s32.totalorder %s28_s16, %s1190_s24  ;;  %p1196_p5 = scmp.lt.s32.totalorder %s1190_s24, %s1190_s24 }
   0xc   :  { %p1197_p6 = por %p1196_p5, %p1195_p4 }
   0xe   :  { %p1198_p7 = pnand %p1197_p6, %p1191_p3 }
  0x10   :  { %1201 = shalt.err (!%p1198_p7)
}
  0x11   :  { %s1275_s25 = smov 512   ;;  %s1276_s26 = smov 32  }
  0x12   :  { %33 = dma.hbm_to_vmem [thread:$0]  %s1689_s1, 8192, %s28_s16, [#allocation6], %s1275_s25, %s1275_s25, %s1276_s26  }
  0x13   :  { %s1277_s29 = smov [#allocation2]   ;;  %s1278_s5 = smov [#allocation7]  }
  0x14   :  { %s18_s30 = sshll.u32 %s1277_s29, 4  ;;  %s41_s6 = sshll.u32 %s1278_s5, 4  ;;  %s19_s30 = int_to_ptr.vmem [resolvable:$true] %s18_s30  ;;  %s42_s6 = int_to_ptr.vmem [resolvable:$true] %s41_s6 }
  0x15   :  { %s1202_s9 = scalar_lea.hbm %s1688_s0, 16 }
  0x16   :  { %p1203_p8 = scmp.ne.s32.totalorder %s1688_s0, %s1202_s9  ;;  %p1206_p9 = scmp.lt.u32.totalorder %s1202_s9, %s1688_s0 }
  0x18   :  { %p1208_p10 = pnand %p1206_p9, %p1203_p8 }
  0x1a   :  { %1211 = shalt.err (!%p1208_p10)
}
  0x1b   :  { %s1212_s1 = scalar_lea.vmem %s19_s30, 16  ;;  %s1216_s14 = scalar_lea.vmem %s19_s30, 32 }
  0x1c   :  { %p1213_p11 = scmp.ne.s32.totalorder %s19_s30, %s1212_s1  ;;  %p1217_p12 = scmp.lt.s32.totalorder %s19_s30, %s19_s30 }
  0x1d   :  { %p1218_p13 = scmp.lt.s32.totalorder %s1216_s14, %s1212_s1 }
  0x1f   :  { %p1219_p0 = por %p1218_p13, %p1217_p12 }
  0x21   :  { %p1220_p1 = pnand %p1219_p0, %p1213_p11 }
  0x23   :  { %1223 = shalt.err (!%p1220_p1)
}
  0x24   :  { %21 = dma.hbm_to_vmem [thread:$0]  %s1688_s0, 16, %s19_s30, [#allocation3]  }
  0x25   :  { %s1224_s19 = scalar_lea.hbm %s1691_s3, 8192 }
  0x26   :  { %p1225_p2 = scmp.ne.s32.totalorder %s1691_s3, %s1224_s19  ;;  %p1228_p3 = scmp.lt.u32.totalorder %s1224_s19, %s1691_s3 }
  0x28   :  { %p1230_p4 = pnand %p1228_p3, %p1225_p2 }
  0x2a   :  { %1233 = shalt.err (!%p1230_p4)
}
  0x2b   :  { %s1234_s24 = scalar_lea.vmem %s42_s6, 8192  ;;  %p1239_p6 = scmp.lt.s32.totalorder %s42_s6, %s42_s6 }
  0x2c   :  { %p1235_p5 = scmp.ne.s32.totalorder %s42_s6, %s1234_s24  ;;  %p1240_p7 = scmp.lt.s32.totalorder %s1234_s24, %s1234_s24 }
  0x2e   :  { %p1241_p8 = por %p1240_p7, %p1239_p6 }
  0x30   :  { %p1242_p9 = pnand %p1241_p8, %p1235_p5 }
  0x32   :  { %1245 = shalt.err (!%p1242_p9)
}
  0x33   :  { %s1279_s0 = smov 128   ;;  %s1280_s25 = smov 8  }
  0x34   :  { %47 = dma.hbm_to_vmem [thread:$0]  %s1691_s3, 8192, %s42_s6, [#allocation6], %s1279_s0, %s1279_s0, %s1280_s25  }
  0x35   :  { %1268 = dma.done.wait [#allocation3], 16  }
  0x36   :  { %1269 = vsyncadd [#allocation3], 4294967280 }
  0x37   :  { %1270 = dma.done.wait [#allocation6], 16384  }
  0x38   :  { %1271 = vsyncadd [#allocation6], 4294950912  ;;  %v1281_v0 = vmov 0.0   ;;  %v59_v1 = vld [vmem:[#allocation5 + $0x8] sm:$0xff]  ;;  %v61_v3 = vld [vmem:[#allocation5 + $0x18] sm:$0xff] }
  0x39   :  { %208 = vmatprep.mubr.f32.mxu0 %v1281_v0  ;;  %279 = vmatprep.mubr.f32.mxu1 %v1281_v0  ;;  %v63_v2 = vld [vmem:[#allocation5 + $0x28] sm:$0xff]  ;;  %v65_v5 = vld [vmem:[#allocation5 + $0x38] sm:$0xff]  ;;  %v58_v6 = vld [vmem:[#allocation5] sm:$0xff] }
  0x3a   :  { %v1005_v4 = vpack.c.bf16 %v63_v2, %v59_v1  ;;  %v62_v7 = vld [vmem:[#allocation5 + $0x20] sm:$0xff]  ;;  %v1037_v8 = vpack.c.bf16 %v65_v5, %v61_v3  ;;  %v60_v10 = vld [vmem:[#allocation5 + $0x10] sm:$0xff]  ;;  %v67_v12 = vld [vmem:[#allocation5 + $0x48] sm:$0xff] }
  0x3b   :  { %v1007_v9 = vpack.c.bf16 %v62_v7, %v58_v6  ;;  %v64_v11 = vld [vmem:[#allocation5 + $0x30] sm:$0xff]  ;;  %v71_v14 = vld [vmem:[#allocation5 + $0x68] sm:$0xff]  ;;  %v69_v15 = vld [vmem:[#allocation5 + $0x58] sm:$0xff] }
  0x3c   :  { %1006 = vmatprep.subr.bf16.mxu0 %v1005_v4  ;;  %v1039_v13 = vpack.c.bf16 %v64_v11, %v60_v10  ;;  %v73_v16 = vld [vmem:[#allocation5 + $0x78] sm:$0xff]  ;;  %1038 = vmatprep.subr.bf16.mxu1 %v1037_v8  ;;  %v1009_v17 = vpack.c.bf16 %v71_v14, %v67_v12  ;;  %v66_v19 = vld [vmem:[#allocation5 + $0x40] sm:$0xff]  ;;  %v68_v21 = vld [vmem:[#allocation5 + $0x50] sm:$0xff] }
  0x3d   :  { %1008 = vmatpush1.bf16.msra.mxu0 %v1007_v9  ;;  %v1041_v18 = vpack.c.bf16 %v73_v16, %v69_v15  ;;  %v70_v20 = vld [vmem:[#allocation5 + $0x60] sm:$0xff]  ;;  %v72_v23 = vld [vmem:[#allocation5 + $0x70] sm:$0xff]  ;;  %v75_v24 = vld [vmem:[#allocation5 + $0x88] sm:$0xff] }
  0x3e   :  { %1040 = vmatpush1.bf16.msra.mxu1 %v1039_v13  ;;  %v1011_v22 = vpack.c.bf16 %v70_v20, %v66_v19  ;;  %v79_v25 = vld [vmem:[#allocation5 + $0xa8] sm:$0xff]  ;;  %1010 = vmatprep.subr.bf16.mxu0 %v1009_v17  ;;  %v1043_v26 = vpack.c.bf16 %v72_v23, %v68_v21  ;;  %v77_v28 = vld [vmem:[#allocation5 + $0x98] sm:$0xff]  ;;  %v74_v30 = vld [vmem:[#allocation5 + $0x80] sm:$0xff] }
  0x3f   :  { %1042 = vmatprep.subr.bf16.mxu1 %v1041_v18  ;;  %v1013_v27 = vpack.c.bf16 %v79_v25, %v75_v24  ;;  %v81_v29 = vld [vmem:[#allocation5 + $0xb8] sm:$0xff]  ;;  %v78_v32 = vld [vmem:[#allocation5 + $0xa0] sm:$0xff]  ;;  %v76_v33 = vld [vmem:[#allocation5 + $0x90] sm:$0xff] }
  0x40   :  { %v1045_v31 = vpack.c.bf16 %v81_v29, %v77_v28  ;;  %v80_v34 = vld [vmem:[#allocation5 + $0xb0] sm:$0xff]  ;;  %v1015_v35 = vpack.c.bf16 %v78_v32, %v74_v30  ;;  %v83_v36 = vld [vmem:[#allocation5 + $0xc8] sm:$0xff]  ;;  %v85_v38 = vld [vmem:[#allocation5 + $0xd8] sm:$0xff] }
  0x41   :  { %1012 = vmatpush1.bf16.msra.mxu0 %v1011_v22  ;;  %v87_v37 = vld [vmem:[#allocation5 + $0xe8] sm:$0xff]  ;;  %v1047_v39 = vpack.c.bf16 %v80_v34, %v76_v33  ;;  %v89_v41 = vld [vmem:[#allocation5 + $0xf8] sm:$0xff]  ;;  %v82_v42 = vld [vmem:[#allocation5 + $0xc0] sm:$0xff] }
  0x42   :  { %1044 = vmatpush1.bf16.msra.mxu1 %v1043_v26  ;;  %1014 = vmatprep.subr.bf16.mxu0 %v1013_v27  ;;  %v1017_v40 = vpack.c.bf16 %v87_v37, %v83_v36  ;;  %v86_v43 = vld [vmem:[#allocation5 + $0xe0] sm:$0xff]  ;;  %v1049_v44 = vpack.c.bf16 %v89_v41, %v85_v38  ;;  %v84_v45 = vld [vmem:[#allocation5 + $0xd0] sm:$0xff]  ;;  %v91_v47 = vld [vmem:[#allocation5 + $0x108] sm:$0xff] }
  0x43   :  { %1046 = vmatprep.subr.bf16.mxu1 %v1045_v31  ;;  %v88_v46 = vld [vmem:[#allocation5 + $0xf0] sm:$0xff]  ;;  %v95_v48 = vld [vmem:[#allocation5 + $0x128] sm:$0xff]  ;;  %v93_v49 = vld [vmem:[#allocation5 + $0x118] sm:$0xff]  ;;  %v1019_v51 = vpack.c.bf16 %v86_v43, %v82_v42 }
  0x44   :  { %v97_v50 = vld [vmem:[#allocation5 + $0x138] sm:$0xff]  ;;  %v1051_v52 = vpack.c.bf16 %v88_v46, %v84_v45  ;;  %v1021_v53 = vpack.c.bf16 %v95_v48, %v91_v47  ;;  %v90_v54 = vld [vmem:[#allocation5 + $0x100] sm:$0xff]  ;;  %v92_v56 = vld [vmem:[#allocation5 + $0x110] sm:$0xff] }
  0x45   :  { %1016 = vmatpush1.bf16.msra.mxu0 %v1015_v35  ;;  %v94_v55 = vld [vmem:[#allocation5 + $0x120] sm:$0xff]  ;;  %v1053_v57 = vpack.c.bf16 %v97_v50, %v93_v49  ;;  %v96_v58 = vld [vmem:[#allocation5 + $0x130] sm:$0xff]  ;;  %v99_v59 = vld [vmem:[#allocation5 + $0x148] sm:$0xff] }
  0x46   :  { %1048 = vmatpush1.bf16.msra.mxu1 %v1047_v39  ;;  %1018 = vmatprep.subr.bf16.mxu0 %v1017_v40  ;;  %v103_v60 = vld [vmem:[#allocation5 + $0x168] sm:$0xff]  ;;  %v101_v61 = vld [vmem:[#allocation5 + $0x158] sm:$0xff]  ;;  %v1023_v63 = vpack.c.bf16 %v94_v55, %v90_v54  ;;  %v1055_v0 = vpack.c.bf16 %v96_v58, %v92_v56  ;;  %v98_v2 = vld [vmem:[#allocation5 + $0x140] sm:$0xff] }
  0x47   :  { %1050 = vmatprep.subr.bf16.mxu1 %v1049_v44  ;;  %v105_v62 = vld [vmem:[#allocation5 + $0x178] sm:$0xff]  ;;  %v1025_v1 = vpack.c.bf16 %v103_v60, %v99_v59  ;;  %v102_v3 = vld [vmem:[#allocation5 + $0x160] sm:$0xff]  ;;  %v100_v4 = vld [vmem:[#allocation5 + $0x150] sm:$0xff] }
  0x48   :  { %v1057_v5 = vpack.c.bf16 %v105_v62, %v101_v61  ;;  %v104_v6 = vld [vmem:[#allocation5 + $0x170] sm:$0xff]  ;;  %v107_v7 = vld [vmem:[#allocation5 + $0x188] sm:$0xff]  ;;  %v109_v9 = vld [vmem:[#allocation5 + $0x198] sm:$0xff]  ;;  %v1027_v11 = vpack.c.bf16 %v102_v3, %v98_v2 }
  0x49   :  { %1020 = vmatpush1.bf16.msra.mxu0 %v1019_v51  ;;  %v111_v8 = vld [vmem:[#allocation5 + $0x1a8] sm:$0xff]  ;;  %v113_v10 = vld [vmem:[#allocation5 + $0x1b8] sm:$0xff]  ;;  %v1059_v12 = vpack.c.bf16 %v104_v6, %v100_v4  ;;  %v106_v14 = vld [vmem:[#allocation5 + $0x180] sm:$0xff] }
  0x4a   :  { %1052 = vmatpush1.bf16.msra.mxu1 %v1051_v52  ;;  %1022 = vmatprep.subr.bf16.mxu0 %v1021_v53  ;;  %v1029_v13 = vpack.c.bf16 %v111_v8, %v107_v7  ;;  %v110_v15 = vld [vmem:[#allocation5 + $0x1a0] sm:$0xff]  ;;  %v108_v16 = vld [vmem:[#allocation5 + $0x190] sm:$0xff]  ;;  %v1061_v17 = vpack.c.bf16 %v113_v10, %v109_v9  ;;  %v115_v19 = vld [vmem:[#allocation5 + $0x1c8] sm:$0xff] }
  0x4b   :  { %1054 = vmatprep.subr.bf16.mxu1 %v1053_v57  ;;  %v112_v18 = vld [vmem:[#allocation5 + $0x1b0] sm:$0xff]  ;;  %v119_v20 = vld [vmem:[#allocation5 + $0x1e8] sm:$0xff]  ;;  %v117_v21 = vld [vmem:[#allocation5 + $0x1d8] sm:$0xff]  ;;  %v1031_v23 = vpack.c.bf16 %v110_v15, %v106_v14 }
  0x4c   :  { %v121_v22 = vld [vmem:[#allocation5 + $0x1f8] sm:$0xff]  ;;  %v1063_v24 = vpack.c.bf16 %v112_v18, %v108_v16  ;;  %v1033_v25 = vpack.c.bf16 %v119_v20, %v115_v19  ;;  %v114_v26 = vld [vmem:[#allocation5 + $0x1c0] sm:$0xff]  ;;  %v116_v29 = vld [vmem:[#allocation5 + $0x1d0] sm:$0xff] }
  0x4d   :  { %1024 = vmatpush1.bf16.msra.mxu0 %v1023_v63  ;;  %v118_v27 = vld [vmem:[#allocation5 + $0x1e0] sm:$0xff]  ;;  %v1065_v28 = vpack.c.bf16 %v121_v22, %v117_v21  ;;  %v120_v30 = vld [vmem:[#allocation5 + $0x1f0] sm:$0xff]  ;;  %v57_v33 = vld [vmem:[#allocation2] sm:$0x1] }
  0x4e   :  { %1056 = vmatpush1.bf16.msra.mxu1 %v1055_v0  ;;  %1026 = vmatprep.subr.bf16.mxu0 %v1025_v1  ;;  %v1035_v31 = vpack.c.bf16 %v118_v27, %v114_v26  ;;  %v1067_v32 = vpack.c.bf16 %v120_v30, %v116_v29  ;;  %v714_v34 = vld [vmem:[#allocation7 + $0x80] sm:$0xff]  ;;  %v715_v35 = vld [vmem:[#allocation7 + $0x88] sm:$0xff]  ;;  %v716_v45 = vld [vmem:[#allocation7 + $0x90] sm:$0xff] }
  0x4f   :  { %1058 = vmatprep.subr.bf16.mxu1 %v1057_v5  ;;  %v746_v36 = vld [vmem:[#allocation7 + $0x180] sm:$0xff]  ;;  %v1069_v37 = vpack.c.bf16 %v715_v35, %v714_v34  ;;  %v747_v38 = vld [vmem:[#allocation7 + $0x188] sm:$0xff]  ;;  %v717_v47 = vld [vmem:[#allocation7 + $0x98] sm:$0xff] }
  0x50   :  { %v698_v39 = vld [vmem:[#allocation7] sm:$0xff]  ;;  %v699_v40 = vld [vmem:[#allocation7 + $0x8] sm:$0xff]  ;;  %v1101_v41 = vpack.c.bf16 %v747_v38, %v746_v36  ;;  %v748_v48 = vld [vmem:[#allocation7 + $0x190] sm:$0xff]  ;;  %v1073_v50 = vpack.c.bf16 %v717_v47, %v716_v45 }
  0x51   :  { %1028 = vmatpush1.bf16.msra.mxu0 %v1027_v11  ;;  %v1071_v42 = vpack.c.bf16 %v699_v40, %v698_v39  ;;  %v730_v43 = vld [vmem:[#allocation7 + $0x100] sm:$0xff]  ;;  %v731_v44 = vld [vmem:[#allocation7 + $0x108] sm:$0xff]  ;;  %v749_v49 = vld [vmem:[#allocation7 + $0x198] sm:$0xff] }
  0x52   :  { %1060 = vmatpush1.bf16.msra.mxu1 %v1059_v12  ;;  %1030 = vmatprep.subr.bf16.mxu0 %v1029_v13  ;;  %v1103_v46 = vpack.c.bf16 %v731_v44, %v730_v43  ;;  %v1105_v51 = vpack.c.bf16 %v749_v49, %v748_v48  ;;  %v700_v52 = vld [vmem:[#allocation7 + $0x10] sm:$0xff]  ;;  %v701_v53 = vld [vmem:[#allocation7 + $0x18] sm:$0xff]  ;;  %v718_v57 = vld [vmem:[#allocation7 + $0xa0] sm:$0xff] }
  0x53   :  { %1062 = vmatprep.subr.bf16.mxu1 %v1061_v17  ;;  %v732_v54 = vld [vmem:[#allocation7 + $0x110] sm:$0xff]  ;;  %v1075_v55 = vpack.c.bf16 %v701_v53, %v700_v52  ;;  %v733_v56 = vld [vmem:[#allocation7 + $0x118] sm:$0xff]  ;;  %v719_v58 = vld [vmem:[#allocation7 + $0xa8] sm:$0xff] }
  0x54   :  { %v1107_v59 = vpack.c.bf16 %v733_v56, %v732_v54  ;;  %v1077_v60 = vpack.c.bf16 %v719_v58, %v718_v57  ;;  %v750_v61 = vld [vmem:[#allocation7 + $0x1a0] sm:$0xff]  ;;  %v751_v62 = vld [vmem:[#allocation7 + $0x1a8] sm:$0xff]  ;;  %v720_v5 = vld [vmem:[#allocation7 + $0xb0] sm:$0xff] }
  0x55   :  { %1032 = vmatpush1.bf16.msra.mxu0 %v1031_v23  ;;  %v702_v63 = vld [vmem:[#allocation7 + $0x20] sm:$0xff]  ;;  %v1109_v0 = vpack.c.bf16 %v751_v62, %v750_v61  ;;  %v703_v1 = vld [vmem:[#allocation7 + $0x28] sm:$0xff]  ;;  %v721_v6 = vld [vmem:[#allocation7 + $0xb8] sm:$0xff] }
  0x56   :  { %1064 = vmatpush1.bf16.msra.mxu1 %v1063_v24  ;;  %1034 = vmatprep.subr.bf16.mxu0 %v1033_v25  ;;  %v734_v2 = vld [vmem:[#allocation7 + $0x120] sm:$0xff]  ;;  %v735_v3 = vld [vmem:[#allocation7 + $0x128] sm:$0xff]  ;;  %v1079_v4 = vpack.c.bf16 %v703_v1, %v702_v63  ;;  %v752_v7 = vld [vmem:[#allocation7 + $0x1b0] sm:$0xff]  ;;  %v1081_v9 = vpack.c.bf16 %v721_v6, %v720_v5 }
  0x57   :  { %1066 = vmatprep.subr.bf16.mxu1 %v1065_v28  ;;  %v1111_v8 = vpack.c.bf16 %v735_v3, %v734_v2  ;;  %v753_v10 = vld [vmem:[#allocation7 + $0x1b8] sm:$0xff]  ;;  %v704_v11 = vld [vmem:[#allocation7 + $0x30] sm:$0xff]  ;;  %v722_v16 = vld [vmem:[#allocation7 + $0xc0] sm:$0xff]  ;;  %v124_v2 = vlaneseq }
  0x58   :  { %v705_v12 = vld [vmem:[#allocation7 + $0x38] sm:$0xff]  ;;  %v1113_v13 = vpack.c.bf16 %v753_v10, %v752_v7  ;;  %v736_v14 = vld [vmem:[#allocation7 + $0x130] sm:$0xff]  ;;  %v723_v17 = vld [vmem:[#allocation7 + $0xc8] sm:$0xff] }
  0x59   :  { %1036 = vmatpush1.bf16.msra.mxu0 %v1035_v31  ;;  %v737_v15 = vld [vmem:[#allocation7 + $0x138] sm:$0xff]  ;;  %v754_v18 = vld [vmem:[#allocation7 + $0x1c0] sm:$0xff]  ;;  %v755_v19 = vld [vmem:[#allocation7 + $0x1c8] sm:$0xff]  ;;  %v1083_v20 = vpack.c.bf16 %v705_v12, %v704_v11  ;;  %v1085_v22 = vpack.c.bf16 %v723_v17, %v722_v16  ;;  %v125_v3 = vshrl.u32 %v124_v2, 7 }
  0x5a   :  { %1068 = vmatpush1.bf16.msra.mxu1 %v1067_v32  ;;  %1070 = vmatprep.subr.bf16.mxu0 %v1069_v37  ;;  %v1115_v21 = vpack.c.bf16 %v737_v15, %v736_v14  ;;  %v706_v23 = vld [vmem:[#allocation7 + $0x40] sm:$0xff]  ;;  %v707_v24 = vld [vmem:[#allocation7 + $0x48] sm:$0xff]  ;;  %v1117_v26 = vpack.c.bf16 %v755_v19, %v754_v18  ;;  %v724_v28 = vld [vmem:[#allocation7 + $0xd0] sm:$0xff] }
  0x5b   :  { %1102 = vmatprep.subr.bf16.mxu1 %v1101_v41  ;;  %v738_v25 = vld [vmem:[#allocation7 + $0x140] sm:$0xff]  ;;  %v739_v27 = vld [vmem:[#allocation7 + $0x148] sm:$0xff]  ;;  %v725_v29 = vld [vmem:[#allocation7 + $0xd8] sm:$0xff]  ;;  %v1087_v32 = vpack.c.bf16 %v707_v24, %v706_v23  ;;  %v134_v6 = vsub.s32 2, %v125_v3  ;;  %v130_v7 = vsub.s32 1, %v125_v3 }
  0x5c   :  { %209 = vmatmul.mubr.f32.vlgmr.msra.gmra.mrb[0].mxu0 %v57_v33  ;;  %v756_v30 = vld [vmem:[#allocation7 + $0x1d0] sm:$0xff]  ;;  %v757_v31 = vld [vmem:[#allocation7 + $0x1d8] sm:$0xff]  ;;  %v1089_v34 = vpack.c.bf16 %v725_v29, %v724_v28  ;;  %v726_v40 = vld [vmem:[#allocation7 + $0xe0] sm:$0xff] }
  0x5d   :  { %280 = vmatmul.mubr.f32.vlgmr.msra.gmra.mrb[0].mxu1 %v57_v33  ;;  %1072 = vmatpush3.bf16.msra.mxu0 %v1071_v42  ;;  %v1119_v33 = vpack.c.bf16 %v739_v27, %v738_v25  ;;  %v708_v35 = vld [vmem:[#allocation7 + $0x50] sm:$0xff]  ;;  %v709_v36 = vld [vmem:[#allocation7 + $0x58] sm:$0xff]  ;;  %v1121_v38 = vpack.c.bf16 %v757_v31, %v756_v30  ;;  %v727_v41 = vld [vmem:[#allocation7 + $0xe8] sm:$0xff] }
  0x5e   :  { %1104 = vmatpush3.bf16.msra.mxu1 %v1103_v46  ;;  %1074 = vmatprep.subr.bf16.mxu0 %v1073_v50  ;;  %v740_v37 = vld [vmem:[#allocation7 + $0x150] sm:$0xff]  ;;  %v741_v39 = vld [vmem:[#allocation7 + $0x158] sm:$0xff]  ;;  %v758_v42 = vld [vmem:[#allocation7 + $0x1e0] sm:$0xff]  ;;  %v1091_v44 = vpack.c.bf16 %v709_v36, %v708_v35  ;;  %v1093_v46 = vpack.c.bf16 %v727_v41, %v726_v40 }
  0x5f   :  { %1106 = vmatprep.subr.bf16.mxu1 %v1105_v51  ;;  %v759_v43 = vld [vmem:[#allocation7 + $0x1e8] sm:$0xff]  ;;  %v1123_v45 = vpack.c.bf16 %v741_v39, %v740_v37  ;;  %v710_v47 = vld [vmem:[#allocation7 + $0x60] sm:$0xff]  ;;  %v728_v52 = vld [vmem:[#allocation7 + $0xf0] sm:$0xff] }
  0x60   :  { %v711_v48 = vld [vmem:[#allocation7 + $0x68] sm:$0xff]  ;;  %v742_v49 = vld [vmem:[#allocation7 + $0x160] sm:$0xff]  ;;  %v1125_v50 = vpack.c.bf16 %v759_v43, %v758_v42  ;;  %v729_v53 = vld [vmem:[#allocation7 + $0xf8] sm:$0xff] }
  0x61   :  { %1076 = vmatpush3.bf16.msra.mxu0 %v1075_v55  ;;  %v743_v51 = vld [vmem:[#allocation7 + $0x168] sm:$0xff]  ;;  %v760_v54 = vld [vmem:[#allocation7 + $0x1f0] sm:$0xff]  ;;  %v761_v55 = vld [vmem:[#allocation7 + $0x1f8] sm:$0xff]  ;;  %v1095_v56 = vpack.c.bf16 %v711_v48, %v710_v47  ;;  %v1097_v58 = vpack.c.bf16 %v729_v53, %v728_v52  ;;  %v1282_v52 = vmov 683565275  }
  0x62   :  { %1108 = vmatpush3.bf16.msra.mxu1 %v1107_v59  ;;  %1078 = vmatprep.subr.bf16.mxu0 %v1077_v60  ;;  %v1127_v57 = vpack.c.bf16 %v743_v51, %v742_v49  ;;  %v712_v59 = vld [vmem:[#allocation7 + $0x70] sm:$0xff]  ;;  %v713_v60 = vld [vmem:[#allocation7 + $0x78] sm:$0xff]  ;;  %v1129_v61 = vpack.c.bf16 %v761_v55, %v760_v54  ;;  %v1283_v54 = vmov 2475754826  }
  0x63   :  { %1110 = vmatprep.subr.bf16.mxu1 %v1109_v0  ;;  %v744_v62 = vld [vmem:[#allocation7 + $0x170] sm:$0xff]  ;;  %v745_v63 = vld [vmem:[#allocation7 + $0x178] sm:$0xff]  ;;  %v1099_v0 = vpack.c.bf16 %v713_v60, %v712_v59  ;;  %v1285_v59 = vmov 2102212464  }
  0x64   :  { %v1131_v1 = vpack.c.bf16 %v745_v63, %v744_v62  ;;  %v122_v5 = vld [vmem:[%s1690_s2] sm:$0xf]  ;;  %s1288_s2 = smov [#allocation8]  }
  0x65   :  { %1080 = vmatpush3.bf16.msra.mxu0 %v1079_v4  ;;  %v126_v4 = vsub.s32 0, %v125_v3  ;;  %v135_v10 = vrot.slane %v122_v5, %v134_v6  ;;  %v131_v11 = vrot.slane %v122_v5, %v130_v7  ;;  %s909_s29 = sshll.u32 %s1288_s2, 4  ;;  %s910_s29 = int_to_ptr.vmem [resolvable:$true] %s909_s29 }
  0x66   :  { %1112 = vmatpush3.bf16.msra.mxu1 %v1111_v8  ;;  %1082 = vmatprep.subr.bf16.mxu0 %v1081_v9  ;;  %v138_v8 = vsub.s32 3, %v125_v3  ;;  %s1246_s30 = scalar_lea.vmem %s910_s29, 16  ;;  %s1250_s5 = scalar_lea.vmem %s910_s29, 32 }
  0x67   :  { %1114 = vmatprep.subr.bf16.mxu1 %v1113_v13  ;;  %v127_v9 = vrot.slane %v122_v5, %v126_v4  ;;  %v1287_v4 = vmov 1326507024   ;;  %p1247_p10 = scmp.ne.s32.totalorder %s910_s29, %s1246_s30  ;;  %p1251_p11 = scmp.lt.s32.totalorder %s910_s29, %s910_s29 }
  0x68   :  { %v139_v12 = vrot.slane %v122_v5, %v138_v8  ;;  %p1252_p12 = scmp.lt.s32.totalorder %s1250_s5, %s1246_s30 }
  0x69   :  { %1084 = vmatpush3.bf16.msra.mxu0 %v1083_v20 }
  0x6a   :  { %1116 = vmatpush3.bf16.msra.mxu1 %v1115_v21  ;;  %1086 = vmatprep.subr.bf16.mxu0 %v1085_v22  ;;  %p1253_p13 = por %p1252_p12, %p1251_p11 }
  0x6b   :  { %1118 = vmatprep.subr.bf16.mxu1 %v1117_v26 }
  0x6c   :  { %p1254_p0 = pnand %p1253_p13, %p1247_p10 }
  0x6d   :  { %1088 = vmatpush3.bf16.msra.mxu0 %v1087_v32 }
  0x6e   :  { %1120 = vmatpush3.bf16.msra.mxu1 %v1119_v33  ;;  %1090 = vmatprep.subr.bf16.mxu0 %v1089_v34 }
  0x6f   :  { %1122 = vmatprep.subr.bf16.mxu1 %v1121_v38 }
  0x71   :  { %1092 = vmatpush3.bf16.msra.mxu0 %v1091_v44 }
  0x72   :  { %1124 = vmatpush3.bf16.msra.mxu1 %v1123_v45  ;;  %1094 = vmatprep.subr.bf16.mxu0 %v1093_v46 }
  0x73   :  { %1126 = vmatprep.subr.bf16.mxu1 %v1125_v50 }
  0x75   :  { %1096 = vmatpush3.bf16.msra.mxu0 %v1095_v56 }
  0x76   :  { %1128 = vmatpush3.bf16.msra.mxu1 %v1127_v57  ;;  %1098 = vmatprep.subr.bf16.mxu0 %v1097_v58  ;;  %v1284_v57 = vmov 2131351028  }
  0x77   :  { %1130 = vmatprep.subr.bf16.mxu1 %v1129_v61  ;;  %v1286_v61 = vmov 920167782  }
  0x79   :  { %1100 = vmatpush3.bf16.msra.mxu0 %v1099_v0 }
  0x7a   :  { %1132 = vmatpush3.bf16.msra.mxu1 %v1131_v1 }
 0x12f   :  { %v210_v13 = vpop.f32.mrb[0].mxu0 }
 0x130   :  { %v1353_v14 = vadd.f32 %v210_v13, %v127_v9  ;;  %v281_v15 = vpop.f32.mrb[0].mxu1  ;;  %v212_v16 = vpop.f32.mrb[1].mxu0 }
 0x131   :  { %v1355_v17 = vadd.f32 %v281_v15, %v135_v10  ;;  %v1357_v18 = vadd.f32 %v212_v16, %v131_v11  ;;  %v283_v19 = vpop.f32.mrb[1].mxu1 }
 0x132   :  { %v286_v20 = vand.u32 2147483647, %v1353_v14  ;;  %v289_v21 = vand.u32 2139095040, %v1353_v14  ;;  %v1361_v22 = vadd.f32 %v283_v19, %v139_v12 }
 0x133   :  { %v492_v23 = vand.u32 2147483647, %v1355_v17  ;;  %v495_v24 = vand.u32 2139095040, %v1355_v17  ;;  %v392_v25 = vand.u32 2139095040, %v1357_v18 }
 0x134   :  { %v290_v26 = vshrl.u32 %v289_v21, 23  ;;  %v293_v27 = vand.u32 8388607, %v286_v20  ;;  %v598_v31 = vand.u32 2139095040, %v1361_v22 }
 0x135   :  { %v496_v28 = vshrl.u32 %v495_v24, 23  ;;  %v499_v29 = vand.u32 8388607, %v492_v23  ;;  %v393_v30 = vshrl.u32 %v392_v25, 23 }
 0x136   :  { %v919_v32 = vadd.s32 4294967169, %v290_v26  ;;  %v294_v33 = vor.u32 8388608, %v293_v27  ;;  %v599_v40 = vshrl.u32 %v598_v31, 23 }
 0x137   :  { %v927_v34 = vadd.s32 4294967169, %v496_v28  ;;  %v923_v35 = vadd.s32 4294967169, %v393_v30  ;;  %v500_v37 = vor.u32 8388608, %v499_v29 }
 0x138   :  { %v296_v36 = vadd.s32 1, %v919_v32  ;;  %v1371_v42 = vshll.u32 %v294_v33, 8  ;;  %v1379_v50 = vadd.s32 4294967169, %v599_v40 }
 0x139   :  { %v502_v38 = vadd.s32 1, %v927_v34  ;;  %v399_v39 = vadd.s32 1, %v923_v35  ;;  %v1377_v49 = vshll.u32 %v500_v37, 8 }
 0x13a   :  { %vm297_vm0 = vcmp.gt.s32.totalorder %v296_v36, 0 }
 0x13b   :  { %v298_v41 = vsel %vm297_vm0, %v296_v36, 0  ;;  %vm503_vm1 = vcmp.gt.s32.totalorder %v502_v38, 0  ;;  %vm400_vm2 = vcmp.gt.s32.totalorder %v399_v39, 0 }
 0x13c   :  { %v299_v43 = vshrl.u32 %v298_v41, 5  ;;  %v300_v44 = vand.u32 31, %v298_v41  ;;  %v504_v45 = vsel %vm503_vm1, %v502_v38, 0  ;;  %v1373_v46 = vsel %vm400_vm2, %v399_v39, 0 }
 0x13d   :  { %v1375_v47 = vshrl.u32 %v504_v45, 5  ;;  %v506_v48 = vand.u32 31, %v504_v45  ;;  %v1384_v56 = vand.u32 31, %v1373_v46 }
 0x13e   :  { %v301_v51 = vsub.s32 32, %v300_v44  ;;  %v303_v53 = vshll.u32 %v1282_v52, %v300_v44  ;;  %v306_v55 = vshll.u32 %v1283_v54, %v300_v44  ;;  %v309_v58 = vshll.u32 %v1284_v57, %v300_v44 }
 0x13f   :  { %v312_v60 = vshll.u32 %v1285_v59, %v300_v44  ;;  %v315_v62 = vshll.u32 %v1286_v61, %v300_v44  ;;  %vm318_vm3 = vcmp.lt.s32.totalorder %v299_v43, 1  ;;  %vm319_vm4 = vcmp.lt.s32.totalorder %v299_v43, 2 }
 0x140   :  { %v304_v63 = vshrl.u32 %v1283_v54, %v301_v51  ;;  %v307_v0 = vshrl.u32 %v1284_v57, %v301_v51  ;;  %v310_v1 = vshrl.u32 %v1285_v59, %v301_v51  ;;  %v302_v2 = vshrl.u32 %v1282_v52, %v301_v51 }
 0x141   :  { %v313_v3 = vshrl.u32 %v1286_v61, %v301_v51  ;;  %v316_v5 = vshrl.u32 %v1287_v4, %v301_v51  ;;  %vm320_vm5 = vcmp.lt.s32.totalorder %v299_v43, 3  ;;  %v507_v9 = vsub.s32 32, %v506_v48 }
 0x142   :  { %v305_v6 = vor.u32 %v304_v63, %v303_v53  ;;  %v308_v7 = vor.u32 %v307_v0, %v306_v55  ;;  %v311_v8 = vor.u32 %v310_v1, %v309_v58  ;;  %vm321_vm6 = vcmp.lt.s32.totalorder %v299_v43, 4 }
 0x143   :  { %v314_v10 = vor.u32 %v313_v3, %v312_v60  ;;  %v317_v11 = vor.u32 %v316_v5, %v315_v62  ;;  %v509_v12 = vshll.u32 %v1282_v52, %v506_v48  ;;  %v512_v26 = vshll.u32 %v1283_v54, %v506_v48 }
 0x144   :  { %v322_v13 = vsel %vm318_vm3, %v302_v2, %v305_v6  ;;  %v323_v15 = vsel %vm321_vm6, %v311_v8, 2102212464  ;;  %v326_v16 = vsel %vm318_vm3, %v305_v6, %v308_v7  ;;  %v330_v19 = vsel %vm318_vm3, %v308_v7, %v311_v8 }
 0x145   :  { %v324_v21 = vsel %vm320_vm5, %v308_v7, %v323_v15  ;;  %v327_v24 = vsel %vm321_vm6, %v314_v10, 920167782  ;;  %v331_v25 = vsel %vm321_vm6, %v317_v11, 1326507024  ;;  %v508_v29 = vshrl.u32 %v1282_v52, %v507_v9 }
 0x146   :  { %v328_v27 = vsel %vm320_vm5, %v311_v8, %v327_v24  ;;  %v332_v28 = vsel %vm320_vm5, %v314_v10, %v331_v25  ;;  %v510_v30 = vshrl.u32 %v1283_v54, %v507_v9  ;;  %v325_v31 = vsel %vm319_vm4, %v322_v13, %v324_v21 }
 0x147   :  { %v329_v32 = vsel %vm319_vm4, %v326_v16, %v328_v27  ;;  %v333_v33 = vsel %vm319_vm4, %v330_v19, %v332_v28  ;;  %v513_v34 = vshrl.u32 %v1284_v57, %v507_v9  ;;  %v515_v41 = vshll.u32 %v1284_v57, %v506_v48 }
 0x148   :  { %v1410_v35 = vmul.u32.u64.low %v1371_v42, %v333_v33  ;;  %v1411_v36 = vmul.u32.u64.high %v1371_v42, %v333_v33, %v1410_v35  ;;  %v1414_v37 = vmul.u32.u64.low %v1371_v42, %v329_v32  ;;  %v1415_v38 = vmul.u32.u64.high %v1371_v42, %v329_v32, %v1414_v37 }
 0x149   :  { %v511_v39 = vor.u32 %v510_v30, %v509_v12  ;;  %v514_v40 = vor.u32 %v513_v34, %v512_v26  ;;  %v516_v44 = vshrl.u32 %v1285_v59, %v507_v9  ;;  %v341_v43 = vmul.u32 %v1371_v42, %v325_v31 }
 0x14a   :  { %v518_v45 = vshll.u32 %v1285_v59, %v506_v48  ;;  %v519_v51 = vshrl.u32 %v1286_v61, %v507_v9  ;;  %v522_v53 = vshrl.u32 %v1287_v4, %v507_v9  ;;  %v521_v58 = vshll.u32 %v1286_v61, %v506_v48 }
 0x14b   :  { %v517_v55 = vor.u32 %v516_v44, %v515_v41  ;;  %vm524_vm7 = vcmp.lt.s32.totalorder %v1375_v47, 1  ;;  %vm525_vm8 = vcmp.lt.s32.totalorder %v1375_v47, 2  ;;  %vm343_vm9 = vc.u32 %v1411_v36, %v1414_v37 }
 0x14c   :  { %v344_v60 = vadd.s32 1, %v1415_v38  ;;  %v520_v62 = vor.u32 %v519_v51, %v518_v45  ;;  %vm526_vm10 = vcmp.lt.s32.totalorder %v1375_v47, 3  ;;  %v523_v42 = vor.u32 %v522_v53, %v521_v58 }
 0x14d   :  { %vm527_vm11 = vcmp.lt.s32.totalorder %v1375_v47, 4  ;;  %v528_v63 = vsel %vm524_vm7, %v508_v29, %v511_v39  ;;  %v532_v0 = vsel %vm524_vm7, %v511_v39, %v514_v40  ;;  %v536_v3 = vsel %vm524_vm7, %v514_v40, %v517_v55 }
 0x14e   :  { %v345_v1 = vsel %vm343_vm9, %v344_v60, %v1415_v38  ;;  %v529_v48 = vsel %vm527_vm11, %v517_v55, 2102212464  ;;  %v533_v2 = vsel %vm527_vm11, %v520_v62, 920167782  ;;  %v537_v8 = vsel %vm527_vm11, %v523_v42, 1326507024 }
 0x14f   :  { %v346_v5 = vadd.s32 %v345_v1, %v341_v43  ;;  %v530_v6 = vsel %vm526_vm10, %v514_v40, %v529_v48  ;;  %v534_v7 = vsel %vm526_vm10, %v517_v55, %v533_v2  ;;  %v538_v10 = vsel %vm526_vm10, %v520_v62, %v537_v8 }
 0x150   :  { %v535_v9 = vsel %vm525_vm8, %v532_v0, %v534_v7  ;;  %v404_v11 = vsub.s32 32, %v1384_v56  ;;  %v539_v13 = vsel %vm525_vm8, %v536_v3, %v538_v10  ;;  %v531_v19 = vsel %vm525_vm8, %v528_v63, %v530_v6 }
 0x151   :  { %v347_v12 = vadd.s32 536870912, %v346_v5  ;;  %v1439_v15 = vmul.u32.u64.low %v1377_v49, %v535_v9  ;;  %v1440_v16 = vmul.u32.u64.high %v1377_v49, %v535_v9, %v1439_v15  ;;  %v605_v25 = vadd.s32 1, %v1379_v50 }
 0x152   :  { %v1446_v21 = vmul.u32.u64.low %v1377_v49, %v539_v13  ;;  %v1447_v24 = vmul.u32.u64.high %v1377_v49, %v539_v13, %v1446_v21  ;;  %v389_v27 = vand.u32 2147483647, %v1357_v18  ;;  %v1454_v28 = vshrl.u32 %v1373_v46, 5 }
 0x153   :  { %v1450_v26 = vshrl.u32 %v347_v12, 30  ;;  %v416_v29 = vshrl.u32 %v1286_v61, %v404_v11  ;;  %v547_v47 = vmul.u32 %v1377_v49, %v531_v19  ;;  %v550_v31 = vadd.s32 1, %v1440_v16 }
 0x154   :  { %v415_v32 = vshll.u32 %v1285_v59, %v1384_v56  ;;  %vm549_vm12 = vc.u32 %v1447_v24, %v1439_v15  ;;  %v419_v50 = vshrl.u32 %v1287_v4, %v404_v11  ;;  %vm606_vm13 = vcmp.gt.s32.totalorder %v605_v25, 0 }
 0x155   :  { %v349_v30 = vshll.u32 %v1450_v26, 30  ;;  %v407_v46 = vshrl.u32 %v1283_v54, %v404_v11  ;;  %v551_v34 = vsel %vm549_vm12, %v550_v31, %v1440_v16  ;;  %v396_v49 = vand.u32 8388607, %v389_v27 }
 0x156   :  { %v552_v35 = vadd.s32 %v551_v34, %v547_v47  ;;  %v417_v38 = vor.u32 %v416_v29, %v415_v32  ;;  %v418_v39 = vshll.u32 %v1286_v61, %v1384_v56  ;;  %v406_v40 = vshll.u32 %v1282_v52, %v1384_v56 }
 0x157   :  { %v1466_v33 = vsub.s32 %v346_v5, %v349_v30  ;;  %v607_v44 = vsel %vm606_vm13, %v605_v25, 0  ;;  %v409_v43 = vshll.u32 %v1283_v54, %v1384_v56  ;;  %v410_v45 = vshrl.u32 %v1284_v57, %v404_v11 }
 0x158   :  { %v553_v51 = vadd.s32 536870912, %v552_v35  ;;  %v420_v53 = vor.u32 %v419_v50, %v418_v39  ;;  %vm424_vm14 = vcmp.lt.s32.totalorder %v1454_v28, 4  ;;  %v408_v55 = vor.u32 %v407_v46, %v406_v40 }
 0x159   :  { %v352_v41 = vsub.s32 0, %v1466_v33  ;;  %v411_v60 = vor.u32 %v410_v45, %v409_v43  ;;  %v412_v62 = vshll.u32 %v1284_v57, %v1384_v56  ;;  %v413_v42 = vshrl.u32 %v1285_v59, %v404_v11 }
 0x15a   :  { %v1484_v63 = vshrl.u32 %v553_v51, 30  ;;  %v430_v0 = vsel %vm424_vm14, %v417_v38, 920167782  ;;  %v609_v1 = vand.u32 31, %v607_v44  ;;  %v397_v48 = vor.u32 8388608, %v396_v49 }
 0x15b   :  { %v920_v58 = vmin.u32 %v352_v41, %v1466_v33  ;;  %v414_v3 = vor.u32 %v413_v42, %v412_v62  ;;  %vm421_vm15 = vcmp.lt.s32.totalorder %v1454_v28, 1  ;;  %vm423_vm0 = vcmp.lt.s32.totalorder %v1454_v28, 3 }
 0x15c   :  { %v555_v5 = vshll.u32 %v1484_v63, 30  ;;  %v434_v56 = vsel %vm424_vm14, %v420_v53, 1326507024  ;;  %v429_v7 = vsel %vm421_vm15, %v408_v55, %v411_v60  ;;  %v1499_v10 = vsub.s32 32, %v609_v1 }
 0x15d   :  { %v354_v2 = vclz %v920_v58  ;;  %v431_v8 = vsel %vm423_vm0, %v414_v3, %v430_v0  ;;  %v426_v12 = vsel %vm424_vm14, %v414_v3, 2102212464  ;;  %v437_v13 = vshll.u32 %v397_v48, 8 }
 0x15e   :  { %v1497_v9 = vsub.s32 %v552_v35, %v555_v5  ;;  %v405_v16 = vshrl.u32 %v1282_v52, %v404_v11  ;;  %vm422_vm2 = vcmp.lt.s32.totalorder %v1454_v28, 2  ;;  %v433_v19 = vsel %vm421_vm15, %v411_v60, %v414_v3 }
 0x15f   :  { %v921_v6 = vadd.s32 4294967294, %v354_v2  ;;  %v432_v29 = vsel %vm422_vm2, %v429_v7, %v431_v8  ;;  %v435_v30 = vsel %vm423_vm0, %v417_v38, %v434_v56  ;;  %v427_v31 = vsel %vm423_vm0, %v411_v60, %v426_v12 }
 0x160   :  { %v558_v25 = vsub.s32 0, %v1497_v9  ;;  %v425_v47 = vsel %vm421_vm15, %v405_v16, %v408_v55  ;;  %v436_v11 = vsel %vm422_vm2, %v433_v19, %v435_v30  ;;  %v622_v32 = vshrl.u32 %v1286_v61, %v1499_v10 }
 0x161   :  { %vm922_vm1 = vcmp.lt.s32.totalorder %v921_v6, 0  ;;  %v1518_v50 = vmul.u32.u64.low %v437_v13, %v436_v11  ;;  %v1519_v46 = vmul.u32.u64.high %v437_v13, %v436_v11, %v1518_v50  ;;  %v621_v39 = vshll.u32 %v1285_v59, %v609_v1 }
 0x162   :  { %v1507_v21 = vsel %vm922_vm1, 0, %v921_v6  ;;  %v1522_v49 = vmul.u32.u64.low %v437_v13, %v432_v29  ;;  %v1523_v35 = vmul.u32.u64.high %v437_v13, %v432_v29, %v1522_v49  ;;  %v928_v38 = vmin.u32 %v558_v25, %v1497_v9 }
 0x163   :  { %v362_v34 = vsub.s32 4294967266, %v1507_v21  ;;  %v428_v40 = vsel %vm422_vm2, %v425_v47, %v427_v31  ;;  %v595_v28 = vand.u32 2147483647, %v1361_v22  ;;  %v1529_v41 = vshrl.u32 %v607_v44, 5 }
 0x164   :  { %v623_v43 = vor.u32 %v622_v32, %v621_v39  ;;  %v624_v45 = vshll.u32 %v1286_v61, %v609_v1  ;;  %v625_v51 = vshrl.u32 %v1287_v4, %v1499_v10  ;;  %vm446_vm3 = vc.u32 %v1519_v46, %v1522_v49 }
 0x165   :  { %v363_v53 = vadd.s32 127, %v362_v34  ;;  %v444_v55 = vmul.u32 %v437_v13, %v428_v40  ;;  %v447_v58 = vadd.s32 1, %v1523_v35  ;;  %v613_v60 = vshrl.u32 %v1283_v54, %v1499_v10 }
 0x166   :  { %v560_v62 = vclz %v928_v38  ;;  %v602_v44 = vand.u32 8388607, %v595_v28  ;;  %v616_v61 = vshrl.u32 %v1284_v57, %v1499_v10  ;;  %v619_v4 = vshrl.u32 %v1285_v59, %v1499_v10 }
 0x167   :  { %v448_v42 = vsel %vm446_vm3, %v447_v58, %v1523_v35  ;;  %v612_v0 = vshll.u32 %v1282_v52, %v609_v1  ;;  %v615_v48 = vshll.u32 %v1283_v54, %v609_v1  ;;  %v618_v2 = vshll.u32 %v1284_v57, %v609_v1 }
 0x168   :  { %v626_v3 = vor.u32 %v625_v51, %v624_v45  ;;  %vm630_vm4 = vcmp.lt.s32.totalorder %v1529_v41, 4  ;;  %v449_v5 = vadd.s32 %v448_v42, %v444_v55  ;;  %v358_v6 = vsub.s32 32, %v1507_v21 }
 0x169   :  { %v614_v56 = vor.u32 %v613_v60, %v612_v0  ;;  %v617_v7 = vor.u32 %v616_v61, %v615_v48  ;;  %v620_v8 = vor.u32 %v619_v4, %v618_v2  ;;  %v364_v12 = vshll.u32 %v363_v53, 23 }
 0x16a   :  { %v929_v13 = vadd.s32 4294967294, %v560_v62  ;;  %v636_v59 = vsel %vm630_vm4, %v623_v43, 920167782  ;;  %v450_v16 = vadd.s32 536870912, %v449_v5  ;;  %v342_v54 = vadd.s32 %v1414_v37, %v1411_v36 }
 0x16b   :  { %v603_v19 = vor.u32 8388608, %v602_v44  ;;  %v640_v57 = vsel %vm630_vm4, %v626_v3, 1326507024  ;;  %vm627_vm5 = vcmp.lt.s32.totalorder %v1529_v41, 1  ;;  %vm629_vm6 = vcmp.lt.s32.totalorder %v1529_v41, 3 }
 0x16c   :  { %v1557_v1 = vshrl.u32 %v450_v16, 30  ;;  %v360_v25 = vshrl.u32 %v342_v54, %v358_v6  ;;  %v635_v29 = vsel %vm627_vm5, %v614_v56, %v617_v7  ;;  %v637_v30 = vsel %vm629_vm6, %v620_v8, %v636_v59 }
 0x16d   :  { %v639_v36 = vsel %vm627_vm5, %v617_v7, %v620_v8  ;;  %v359_v37 = vshll.u32 %v1466_v33, %v1507_v21  ;;  %v365_v47 = vor.u32 4788187, %v364_v12  ;;  %vm930_vm7 = vcmp.lt.s32.totalorder %v929_v13, 0 }
 0x16e   :  { %v452_v31 = vshll.u32 %v1557_v1, 30  ;;  %vm628_vm8 = vcmp.lt.s32.totalorder %v1529_v41, 2  ;;  %v632_v11 = vsel %vm630_vm4, %v620_v8, 2102212464  ;;  %v641_v32 = vsel %vm629_vm6, %v623_v43, %v640_v57 }
 0x16f   :  { %v643_v50 = vshll.u32 %v603_v19, 8  ;;  %v611_v35 = vshrl.u32 %v1282_v52, %v1499_v10  ;;  %v638_v33 = vsel %vm628_vm8, %v635_v29, %v637_v30  ;;  %v642_v21 = vsel %vm628_vm8, %v639_v36, %v641_v32 }
 0x170   :  { %v453_v34 = vsub.s32 %v449_v5, %v452_v31  ;;  %v361_v38 = vor.u32 %v360_v25, %v359_v37  ;;  %v563_v45 = vsel %vm930_vm7, 0, %v929_v13  ;;  %v633_v53 = vsel %vm629_vm6, %v617_v7, %v632_v11 }
 0x171   :  { %v1581_v39 = vmul.u32.u64.low %v643_v50, %v642_v21  ;;  %v1582_v40 = vmul.u32.u64.high %v643_v50, %v642_v21, %v1581_v39  ;;  %v631_v43 = vsel %vm627_vm5, %v611_v35, %v614_v56  ;;  %v366_v55 = vand.u32 2147483647, %v365_v47 }
 0x172   :  { %v455_v51 = vsub.s32 0, %v453_v34  ;;  %v1588_v52 = vmul.u32.u64.low %v643_v50, %v638_v33  ;;  %v1589_v10 = vmul.u32.u64.high %v643_v50, %v638_v33, %v1588_v52  ;;  %v368_v60 = vcvt.s32.f32 %v361_v38 }
 0x173   :  { %v568_v62 = vsub.s32 4294967266, %v563_v45  ;;  %v634_v44 = vsel %vm628_vm8, %v631_v43, %v633_v53  ;;  %v564_v56 = vsub.s32 32, %v563_v45  ;;  %v445_v41 = vadd.s32 %v1522_v49, %v1519_v46 }
 0x174   :  { %v924_v58 = vmin.u32 %v455_v51, %v453_v34  ;;  %vm652_vm9 = vc.u32 %v1582_v40, %v1588_v52  ;;  %v369_v4 = vmul.f32 %v368_v60, %v366_v55  ;;  %v653_v42 = vadd.s32 1, %v1589_v10 }
 0x175   :  { %v650_v48 = vmul.u32 %v643_v50, %v634_v44  ;;  %v569_v2 = vadd.s32 127, %v568_v62  ;;  %vm288_vm11 = vcmp.lt.s32.totalorder %v1353_v14, 0  ;;  %v548_v59 = vadd.s32 %v1439_v15, %v1447_v24 }
 0x176   :  { %v457_v61 = vclz %v924_v58  ;;  %v654_v3 = vsel %vm652_vm9, %v653_v42, %v1589_v10  ;;  %v370_v6 = vxor.u32 2147483648, %v369_v4  ;;  %v565_v37 = vshll.u32 %v1497_v9, %v563_v45 }
 0x177   :  { %v655_v5 = vadd.s32 %v654_v3, %v650_v48  ;;  %v570_v16 = vshll.u32 %v569_v2, 23  ;;  %v566_v30 = vshrl.u32 %v548_v59, %v564_v56  ;;  %vm1611_vm12 = vcmp.le.f32.partialorder %v286_v20, 0.7853982 }
 0x178   :  { %v925_v0 = vadd.s32 4294967294, %v457_v61  ;;  %v371_v29 = vsel %vm288_vm11, %v370_v6, %v369_v4  ;;  %v372_v45 = vsub.s32 4, %v1450_v26  ;;  %vm391_vm13 = vcmp.lt.s32.totalorder %v1357_v18, 0 }
 0x179   :  { %v656_v13 = vadd.s32 536870912, %v655_v5  ;;  %v571_v47 = vor.u32 4788187, %v570_v16  ;;  %v374_v11 = vsel %vm1611_vm12, %v1353_v14, %v371_v29  ;;  %v567_v32 = vor.u32 %v566_v30, %v565_v37 }
 0x17a   :  { %vm926_vm10 = vcmp.lt.s32.totalorder %v925_v0, 0  ;;  %1164 = vcosq.f32 %v374_v11  ;;  %vm1622_vm14 = vcmp.le.f32.partialorder %v389_v27, 0.7853982  ;;  %v475_v55 = vsub.s32 4, %v1557_v1 }
 0x17b   :  { %v460_v7 = vsel %vm926_vm10, 0, %v925_v0  ;;  %v1603_v25 = vshrl.u32 %v656_v13, 30  ;;  %v572_v33 = vand.u32 2147483647, %v571_v47  ;;  %1166 = vsinq.f32 %v374_v11 }
 0x17c   :  { %v461_v8 = vsub.s32 32, %v460_v7  ;;  %v465_v12 = vsub.s32 4294967266, %v460_v7  ;;  %v462_v54 = vshll.u32 %v453_v34, %v460_v7  ;;  %v574_v38 = vcvt.s32.f32 %v567_v32 }
 0x17d   :  { %v658_v49 = vshll.u32 %v1603_v25, 30  ;;  %v373_v60 = vsel %vm288_vm11, %v372_v45, %v1450_v26  ;;  %v476_v44 = vsel %vm391_vm13, %v475_v55, %v1557_v1  ;;  %v651_v61 = vadd.s32 %v1588_v52, %v1582_v40 }
 0x17e   :  { %v463_v19 = vshrl.u32 %v445_v41, %v461_v8  ;;  %v466_v57 = vadd.s32 127, %v465_v12  ;;  %v575_v51 = vmul.f32 %v574_v38, %v572_v33  ;;  %v375_v48 = vsel %vm1611_vm12, 0, %v373_v60 }
 0x17f   :  { %v659_v31 = vsub.s32 %v655_v5, %v658_v49  ;;  %vm494_vm0 = vcmp.lt.s32.totalorder %v1355_v17, 0  ;;  %v478_v1 = vsel %vm1622_vm14, 0, %v476_v44  ;;  %v379_v52 = vand.u32 3, %v375_v48 }
 0x180   :  { %v464_v36 = vor.u32 %v463_v19, %v462_v54  ;;  %v467_v46 = vshll.u32 %v466_v57, 23  ;;  %v576_v62 = vxor.u32 2147483648, %v575_v51  ;;  %vm1645_vm1 = vcmp.le.f32.partialorder %v492_v23, 0.7853982 }
 0x181   :  { %v661_v35 = vsub.s32 0, %v659_v31  ;;  %v482_v12 = vand.u32 3, %v478_v1  ;;  %vm381_vm2 = vcmp.eq.s32.totalorder %v379_v52, 0  ;;  %vm384_vm3 = vcmp.eq.s32.totalorder %v379_v52, 2 }
 0x182   :  { %v468_v24 = vor.u32 4788187, %v467_v46  ;;  %v471_v34 = vcvt.s32.f32 %v464_v36  ;;  %v577_v6 = vsel %vm494_vm0, %v576_v62, %v575_v51  ;;  %vm380_vm7 = vcmp.lt.s32.totalorder %v379_v52, 2 }
 0x183   :  { %v932_v21 = vmin.u32 %v661_v35, %v659_v31  ;;  %v580_v59 = vsel %vm1645_vm1, %v1355_v17, %v577_v6  ;;  %vm487_vm4 = vcmp.eq.s32.totalorder %v482_v12, 2  ;;  %vm483_vm5 = vcmp.lt.s32.totalorder %v482_v12, 2 }
 0x184   :  { %v469_v50 = vand.u32 2147483647, %v468_v24  ;;  %v1165_v0 = vpop.eup %1164  ;;  %vm484_vm6 = vcmp.eq.s32.totalorder %v482_v12, 0  ;;  %v578_v24 = vsub.s32 4, %v1484_v63  ;;  %vm481_vm8 = vweird.f32 %v1357_v18 }
 0x185   :  { %v663_v39 = vclz %v932_v21  ;;  %v1167_v2 = vpop.eup %1166  ;;  %v385_v41 = vxor.u32 2147483648, %v1165_v0  ;;  %vm1656_vm9 = vcmp.le.f32.partialorder %v595_v28, 0.7853982  ;;  %vm597_vm10 = vcmp.lt.s32.totalorder %v1361_v22, 0 }
 0x186   :  { %v472_v9 = vmul.f32 %v471_v34, %v469_v50  ;;  %v382_v7 = vxor.u32 2147483648, %v1167_v2  ;;  %v681_v34 = vsub.s32 4, %v1603_v25  ;;  %vm378_vm11 = vweird.f32 %v1353_v14 }
 0x187   :  { %v933_v10 = vadd.s32 4294967294, %v663_v39  ;;  %v386_v36 = vsel %vm384_vm3, %v385_v41, %v1167_v2  ;;  %v579_v28 = vsel %vm494_vm0, %v578_v24, %v1484_v63  ;;  %vm584_vm3 = vweird.f32 %v1355_v17 }
 0x188   :  { %v473_v20 = vxor.u32 2147483648, %v472_v9  ;;  %v383_v30 = vsel %vm381_vm2, %v1165_v0, %v382_v7  ;;  %v682_v33 = vsel %vm597_vm10, %v681_v34, %v1603_v25  ;;  %v581_v21 = vsel %vm1645_vm1, 0, %v579_v28 }
 0x189   :  { %vm934_vm15 = vcmp.lt.s32.totalorder %v933_v10, 0  ;;  %v387_v15 = vsel %vm380_vm7, %v383_v30, %v386_v36  ;;  %v684_v38 = vsel %vm1656_vm9, 0, %v682_v33  ;;  %vm687_vm2 = vweird.f32 %v1361_v22 }
 0x18a   :  { %v474_v53 = vsel %vm391_vm13, %v473_v20, %v472_v9  ;;  %v666_v27 = vsel %vm934_vm15, 0, %v933_v10  ;;  %v388_v35 = vsel %vm378_vm11, nan, %v387_v15  ;;  %v585_v20 = vand.u32 3, %v581_v21 }
 0x18b   :  { %v477_v58 = vsel %vm1622_vm14, %v1357_v18, %v474_v53  ;;  %v667_v4 = vsub.s32 32, %v666_v27  ;;  %v671_v42 = vsub.s32 4294967266, %v666_v27  ;;  %v668_v3 = vshll.u32 %v659_v31, %v666_v27 }
 0x18c   :  { %1168 = vcosq.f32 %v477_v58  ;;  %v688_v51 = vand.u32 3, %v684_v38  ;;  %vm587_vm12 = vcmp.eq.s32.totalorder %v585_v20, 0  ;;  %vm590_vm13 = vcmp.eq.s32.totalorder %v585_v20, 2 }
 0x18d   :  { %1170 = vsinq.f32 %v477_v58  ;;  %v669_v5 = vshrl.u32 %v651_v61, %v667_v4  ;;  %v672_v26 = vadd.s32 127, %v671_v42  ;;  %vm586_vm0 = vcmp.lt.s32.totalorder %v585_v20, 2 }
 0x18e   :  { %1172 = vcosq.f32 %v580_v59  ;;  %vm693_vm14 = vcmp.eq.s32.totalorder %v688_v51, 2  ;;  %vm690_vm15 = vcmp.eq.s32.totalorder %v688_v51, 0  ;;  %vm689_vm1 = vcmp.lt.s32.totalorder %v688_v51, 2 }
 0x18f   :  { %v670_v56 = vor.u32 %v669_v5, %v668_v3  ;;  %v673_v40 = vshll.u32 %v672_v26, 23  ;;  %1174 = vsinq.f32 %v580_v59 }
 0x191   :  { %v674_v13 = vor.u32 4788187, %v673_v40  ;;  %v677_v19 = vcvt.s32.f32 %v670_v56 }
 0x193   :  { %v675_v54 = vand.u32 2147483647, %v674_v13 }
 0x195   :  { %v678_v46 = vmul.f32 %v677_v19, %v675_v54 }
 0x196   :  { %v1169_v16 = vpop.eup %1168 }
 0x197   :  { %v1171_v57 = vpop.eup %1170  ;;  %v488_v29 = vxor.u32 2147483648, %v1169_v16  ;;  %v679_v47 = vxor.u32 2147483648, %v678_v46 }
 0x198   :  { %v485_v23 = vxor.u32 2147483648, %v1171_v57  ;;  %v1173_v9 = vpop.eup %1172 }
 0x199   :  { %v489_v49 = vsel %vm487_vm4, %v488_v29, %v1171_v57  ;;  %v680_v50 = vsel %vm597_vm10, %v679_v47, %v678_v46  ;;  %v1175_v14 = vpop.eup %1174  ;;  %v591_v45 = vxor.u32 2147483648, %v1173_v9 }
 0x19a   :  { %v486_v37 = vsel %vm484_vm6, %v1169_v16, %v485_v23  ;;  %v683_v18 = vsel %vm1656_vm9, %v1361_v22, %v680_v50  ;;  %v588_v39 = vxor.u32 2147483648, %v1175_v14 }
 0x19b   :  { %v490_v31 = vsel %vm483_vm5, %v486_v37, %v489_v49  ;;  %1176 = vcosq.f32 %v683_v18  ;;  %v592_v10 = vsel %vm590_vm13, %v591_v45, %v1175_v14 }
 0x19c   :  { %v491_v32 = vsel %vm481_vm8, nan, %v490_v31  ;;  %1178 = vsinq.f32 %v683_v18  ;;  %v589_v55 = vsel %vm587_vm12, %v1173_v9, %v588_v39 }
 0x19d   :  { %826 = vmatprep.mubr.f32.mxu0 %v491_v32  ;;  %v593_v62 = vsel %vm586_vm0, %v589_v55, %v592_v10 }
 0x19e   :  { %827 = vmatmul.mubr.f32.vlgmr.msra.gmra.mrb[2].mxu0 %v388_v35  ;;  %v594_v61 = vsel %vm584_vm3, nan, %v593_v62 }
 0x1a5   :  { %v1177_v43 = vpop.eup %1176 }
 0x1a6   :  { %v1179_v53 = vpop.eup %1178  ;;  %v694_v63 = vxor.u32 2147483648, %v1177_v43 }
 0x1a7   :  { %v691_v25 = vxor.u32 2147483648, %v1179_v53 }
 0x1a8   :  { %v695_v58 = vsel %vm693_vm14, %v694_v63, %v1179_v53 }
 0x1a9   :  { %v692_v60 = vsel %vm690_vm15, %v1177_v43, %v691_v25 }
 0x1aa   :  { %v696_v27 = vsel %vm689_vm1, %v692_v60, %v695_v58 }
 0x1ab   :  { %v697_v44 = vsel %vm687_vm2, nan, %v696_v27 }
 0x1ac   :  { %896 = vmatprep.mubr.f32.mxu1 %v697_v44 }
 0x1ad   :  { %897 = vmatmul.mubr.f32.vlgmr.msra.gmra.mrb[2].mxu1 %v594_v61 }
 0x271   :  { %v967_v4 = vpop.f32.mrb[2].mxu0 }
 0x272   :  { %v968_v42 = vpop.f32.mrb[3].mxu0 }
 0x273   :  { %v969_v0 = vadd.f32 %v968_v42, %v967_v4 }
 0x280   :  { %v1002_v48 = vpop.f32.mrb[2].mxu1 }
 0x281   :  { %v1003_v2 = vpop.f32.mrb[3].mxu1 }
 0x282   :  { %v1004_v3 = vadd.f32 %v1003_v2, %v1002_v48 }
 0x284   :  { %v899_v5 = vadd.f32 %v1004_v3, %v969_v0 }
 0x286   :  { %902 = vst [vmem:[#allocation8] sm:$0x1] %v899_v5 }
 0x287   :  { %1257 = shalt.err (!%p1254_p0)
}
 0x288   :  { %s1258_s8 = scalar_lea.hbm %s1692_s4, 16 }
 0x289   :  { %p1259_p1 = scmp.ne.s32.totalorder %s1692_s4, %s1258_s8  ;;  %p1262_p2 = scmp.lt.u32.totalorder %s1258_s8, %s1692_s4 }
 0x28b   :  { %p1264_p3 = pnand %p1262_p2, %p1259_p1 }
 0x28d   :  { %1267 = shalt.err (!%p1264_p3)
}
 0x28e   :  { %912 = dma.vmem_to_hbm [thread:$0]  %s910_s29, 16, %s1692_s4, [#allocation4]  }
 0x28f   :  { %1272 = dma.done.wait [#allocation4], 16  }
 0x290   :  { %1273 = vsyncadd [#allocation4], 4294967280 }
 0x291   :  { %916 = vsyncpa [#allocation3], 1 }
 0x292   :  { %917 = vsyncpa [#allocation6], 1 }
 0x293   :  { %918 = vsyncpa [#allocation4], 1 }

</bundles_post_ra>
